<compile_context>
chip_gen: v5e
topology: v5e:2x2
jax: 0.10.0
libtpu: 0.0.40
codegen_flags: <defaults>
</compile_context>

<pallas_src>
import functools

import jax
import jax.numpy as jnp
from jax import lax
from jax.experimental import pallas as pl
from jax.experimental.pallas import tpu as pltpu


# Set to jnp.bfloat16 on v6e/v7x for ~2x MXU throughput (f32 accumulation is kept).
COMPUTE_DTYPE = jnp.float32


# ----------------------------- Pallas kernel -------------------------------

def _bilstm_kernel(*refs, apply_mask):
    """Fused bidirectional LSTM layer. Grid axis = time (sequential, 'arbitrary').

    refs (in order):
      gxf_ref : (1, B, 8H)  precomputed input gates (bias folded in) at time t
      gxb_ref : (1, B, 8H)  precomputed input gates at time T-1-t
      whh_ref : (H, 8H)     [W_hh_fwd | W_hh_bwd], gate cols ordered (i, f, o, g)
      mask_ref: (T, B, 1)   only when apply_mask
      out_ref : (T, B, 2H)  resident output block, written once at the last step
      h_sc    : (2B, H)     hidden state; rows [:B] forward, [B:] backward
      c_sc    : (2B, H)     cell state
      of_sc   : (T, B, H)   forward hiddens (time-major)
      ob_sc   : (T, B, H)   backward hiddens (time-major, already un-reversed)
    """
    if apply_mask:
        gxf_ref, gxb_ref, whh_ref, mask_ref, out_ref, h_sc, c_sc, of_sc, ob_sc = refs
    else:
        gxf_ref, gxb_ref, whh_ref, out_ref, h_sc, c_sc, of_sc, ob_sc = refs
        mask_ref = None

    t = pl.program_id(0)
    t_last = pl.num_programs(0) - 1
    H = h_sc.shape[-1]
    B = of_sc.shape[1]
    G = 4 * H

    @pl.when(t == 0)
    def _():
        h_sc[...] = jnp.zeros_like(h_sc)
        c_sc[...] = jnp.zeros_like(c_sc)

    # One wide MXU matmul for both directions' recurrent projection.
    rec = jnp.dot(h_sc[...].astype(whh_ref.dtype), whh_ref[...],
                  preferred_element_type=jnp.float32)          # (2B, 8H)

    gx_f = gxf_ref[0][:, :G]                                   # (B, 4H) fwd @ time t
    gx_b = gxb_ref[0][:, G:]                                   # (B, 4H) bwd @ time T-1-t
    gates = jnp.concatenate(
        [gx_f + rec[:B, :G], gx_b + rec[B:, G:]], axis=0)      # (2B, 4H)

    # Gate order (i, f, o, g): one sigmoid over 3H, one tanh over H.
    sig = jax.nn.sigmoid(gates[:, :3 * H])
    i_g = sig[:, 0:H]
    f_g = sig[:, H:2 * H]
    o_g = sig[:, 2 * H:3 * H]
    g_g = jnp.tanh(gates[:, 3 * H:])

    c_new = f_g * c_sc[...] + i_g * g_g
    h_new = o_g * jnp.tanh(c_new)
    c_sc[...] = c_new
    h_sc[...] = h_new

    of_sc[t] = h_new[:B]            # forward hidden for time t
    ob_sc[t_last - t] = h_new[B:]   # backward hidden for time T-1-t

    @pl.when(t == t_last)
    def _():
        if apply_mask:
            m = mask_ref[...]                       # (T, B, 1), broadcast along lanes
            out_ref[:, :, :H] = of_sc[...] * m
            out_ref[:, :, H:] = ob_sc[...] * m
        else:
            out_ref[:, :, :H] = of_sc[...]
            out_ref[:, :, H:] = ob_sc[...]


# ----------------------------- wrappers -------------------------------------

def _bilstm_layer(gx, whh_cat, mask_tb1=None):
    """Run one fused bidirectional LSTM layer.

    gx      : (T, B, 8H) precomputed input gates (bias included), time-major, f32
    whh_cat : (H, 8H)    fused recurrent weights
    mask_tb1: (T, B, 1)  or None; if given, output is multiplied by the mask
    returns (T, B, 2H) float32, time-major.
    """
    T, B, G8 = gx.shape
    H = whh_cat.shape[0]
    assert G8 == 8 * H

    apply_mask = mask_tb1 is not None
    kernel = functools.partial(_bilstm_kernel, apply_mask=apply_mask)

    in_specs = [
        pl.BlockSpec((1, B, 8 * H), lambda t: (t, 0, 0)),
        pl.BlockSpec((1, B, 8 * H), lambda t: (T - 1 - t, 0, 0)),
        pl.BlockSpec((H, 8 * H), lambda t: (0, 0)),
    ]
    inputs = [gx, gx, whh_cat]
    if apply_mask:
        in_specs.append(pl.BlockSpec((T, B, 1), lambda t: (0, 0, 0)))
        inputs.append(mask_tb1)

    return pl.pallas_call(
        kernel,
        out_shape=jax.ShapeDtypeStruct((T, B, 2 * H), jnp.float32),
        grid=(T,),
        in_specs=in_specs,
        out_specs=pl.BlockSpec((T, B, 2 * H), lambda t: (0, 0, 0)),
        scratch_shapes=[
            pltpu.VMEM((2 * B, H), jnp.float32),   # h (fwd rows, bwd rows)
            pltpu.VMEM((2 * B, H), jnp.float32),   # c
            pltpu.VMEM((T, B, H), jnp.float32),    # forward outputs
            pltpu.VMEM((T, B, H), jnp.float32),    # backward outputs
        ],
        compiler_params=pltpu.CompilerParams(
            dimension_semantics=("arbitrary",)),
    )(*inputs)


@jax.jit
def sent_encoder_forward(params, sent_reps, sent_masks):
    """Pallas implementation of SentEncoder.forward (eval mode).

    sent_reps : (B, T, D) f32, sent_masks : (B, T) f32 -> (B, T, 2*H) f32
    """
    mask_tb1 = jnp.transpose(sent_masks, (1, 0))[:, :, None]      # (T, B, 1)
    x = sent_reps
    eq = "btd,dg->tbg"        # first layer absorbs the batch-first -> time-major layout
    n_layers = len(params)
    for li, layer in enumerate(params):
        # Hoisted input projection: one big matmul over all time steps, both directions.
        gx = jnp.einsum(eq, x.astype(layer["wih"].dtype), layer["wih"],
                        preferred_element_type=jnp.float32) + layer["b"]   # (T, B, 8H)
        last = li == n_layers - 1
        x = _bilstm_layer(gx, layer["whh"], mask_tb1 if last else None)    # (T, B, 2H)
        eq = "tbd,dg->tbg"
    return jnp.transpose(x, (1, 0, 2))                            # (B, T, 2H)


# ----------------------------- parameters -----------------------------------

def init_params(key, input_size, hidden, num_layers):
    """PyTorch nn.LSTM-style params: U(-1/sqrt(H), 1/sqrt(H)), gate rows (i, f, g, o)."""
    k = hidden ** -0.5
    params = []
    in_size = input_size
    for _ in range(num_layers):
        layer = {}
        for tag in ("fwd", "bwd"):
            key, k1, k2, k3, k4 = jax.random.split(key, 5)
            layer[tag] = {
                "w_ih": jax.random.uniform(k1, (4 * hidden, in_size), jnp.float32, -k, k),
                "w_hh": jax.random.uniform(k2, (4 * hidden, hidden), jnp.float32, -k, k),
                "b_ih": jax.random.uniform(k3, (4 * hidden,), jnp.float32, -k, k),
                "b_hh": jax.random.uniform(k4, (4 * hidden,), jnp.float32, -k, k),
            }
        params.append(layer)
        in_size = 2 * hidden
    return params


def _reorder_ifog(w, hidden):
    """PyTorch gate order (i, f, g, o) -> kernel order (i, f, o, g) along the 4H axis."""
    i, f, g, o = (w[j * hidden:(j + 1) * hidden] for j in range(4))
    return jnp.concatenate([i, f, o, g], axis=0)


def prepare_params(torch_params, hidden, compute_dtype=jnp.float32):
    """Fuse per-layer weights for the kernel: (D, 8H), (H, 8H), (1, 1, 8H)."""
    prepped = []
    for layer in torch_params:
        wih_parts, whh_parts, b_parts = [], [], []
        for tag in ("fwd", "bwd"):
            p = layer[tag]
            wih_parts.append(_reorder_ifog(p["w_ih"], hidden).T)              # (D, 4H)
            whh_parts.append(_reorder_ifog(p["w_hh"], hidden).T)              # (H, 4H)
            b_parts.append(_reorder_ifog(p["b_ih"] + p["b_hh"], hidden))      # (4H,)
        prepped.append({
            "wih": jnp.concatenate(wih_parts, axis=1).astype(compute_dtype),  # (D, 8H)
            "whh": jnp.concatenate(whh_parts, axis=1).astype(compute_dtype),  # (H, 8H)
            "b": jnp.concatenate(b_parts, axis=0)[None, None, :],             # (1,1,8H) f32
        })
    return prepped


# ----------------------------- pure-JAX reference ----------------------------

def _lstm_dir_ref(x_tbd, p, reverse):
    H = p["w_hh"].shape[1]
    wih, whh = p["w_ih"].T, p["w_hh"].T
    b = (p["b_ih"] + p["b_hh"])[None, :]

    def step(carry, x_t):
        h, c = carry
        gates = x_t @ wih + h @ whh + b
        i = jax.nn.sigmoid(gates[:, 0 * H:1 * H])
        f = jax.nn.sigmoid(gates[:, 1 * H:2 * H])
        g = jnp.tanh(gates[:, 2 * H:3 * H])
        o = jax.nn.sigmoid(gates[:, 3 * H:4 * H])
        c_new = f * c + i * g
        h_new = o * jnp.tanh(c_new)
        return (h_new, c_new), h_new

    xs = x_tbd[::-1] if reverse else x_tbd
    B = x_tbd.shape[1]
    init = (jnp.zeros((B, H), jnp.float32), jnp.zeros((B, H), jnp.float32))
    _, hs = lax.scan(step, init, xs)
    return hs[::-1] if reverse else hs


def sent_encoder_ref(torch_params, sent_reps, sent_masks):
    x = jnp.transpose(sent_reps, (1, 0, 2))
    for layer in torch_params:
        fwd = _lstm_dir_ref(x, layer["fwd"], False)
        bwd = _lstm_dir_ref(x, layer["bwd"], True)
        x = jnp.concatenate([fwd, bwd], axis=-1)
    return jnp.transpose(x, (1, 0, 2)) * sent_masks[:, :, None]


# ----------------------------- main ------------------------------------------

if __name__ == "__main__":
    # Small shapes consistent with the module (sent_hidden_size shrunk for the demo).
    B, T = 2, 8
    sent_rep_size = 32
    sent_hidden_size = 32
    sent_num_layers = 2

    key = jax.random.PRNGKey(0)
    kp, kx, km = jax.random.split(key, 3)

    torch_params = init_params(kp, sent_rep_size, sent_hidden_size, sent_num_layers)
    params = prepare_params(torch_params, sent_hidden_size, COMPUTE_DTYPE)

    sent_reps = jax.random.normal(kx, (B, T, sent_rep_size), jnp.float32)
    sent_masks = (jax.random.uniform(km, (B, T)) > 0.2).astype(jnp.float32)

    out = jax.block_until_ready(sent_encoder_forward(params, sent_reps, sent_masks))
    ref = jax.block_until_ready(sent_encoder_ref(torch_params, sent_reps, sent_masks))

    assert out.shape == (B, T, 2 * sent_hidden_size)
    assert jnp.allclose(out, ref, atol=5e-3, rtol=5e-3), "mismatch vs JAX reference"

    print("KERNEL_OK")
</pallas_src>

<mosaic_0001>
module attributes {stable_mosaic.version = 11 : i64} {
  func.func @_bilstm_kernel(%arg0: i32, %arg1: memref<1x2x256xf32, #tpu.memory_space<vmem>>, %arg2: memref<1x2x256xf32, #tpu.memory_space<vmem>>, %arg3: memref<32x256xf32, #tpu.memory_space<vmem>>, %arg4: memref<8x2x64xf32, #tpu.memory_space<vmem>>, %arg5: memref<4x32xf32, #tpu.memory_space<vmem>>, %arg6: memref<4x32xf32, #tpu.memory_space<vmem>>, %arg7: memref<8x2x32xf32, #tpu.memory_space<vmem>>, %arg8: memref<8x2x32xf32, #tpu.memory_space<vmem>>) attributes {dimension_semantics = [#tpu.dimension_semantics<arbitrary>], iteration_bounds = array<i64: 8>, scalar_prefetch = 0 : i64, scratch_operands = 4 : i64, tpu.core_type = #tpu.core_type<tc>, window_params = [{transform_indices = @transform_0, window_bounds = array<i64: 1, 2, 256>}, {transform_indices = @transform_1, window_bounds = array<i64: 1, 2, 256>}, {pipeline_mode = #tpu.pipeline_mode<synchronous>, transform_indices = @transform_2, window_bounds = array<i64: 32, 256>}, {pipeline_mode = #tpu.pipeline_mode<synchronous>, transform_indices = @transform_3, window_bounds = array<i64: 8, 2, 64>}]} {
    %c0_i32 = arith.constant 0 : i32
    %0 = arith.cmpi eq, %arg0, %c0_i32 : i32
    %1 = arith.extui %0 : i1 to i32
    %c0_i32_0 = arith.constant 0 : i32
    %2 = arith.cmpi ne, %1, %c0_i32_0 : i32
    scf.if %2 {
      %cst_23 = arith.constant 0.000000e+00 : f32
      %50 = vector.broadcast %cst_23 : f32 to vector<4x32xf32>
      %c0_24 = arith.constant 0 : index
      %c0_25 = arith.constant 0 : index
      %51 = vector.load %arg5[%c0_24, %c0_25] : memref<4x32xf32, #tpu.memory_space<vmem>>, vector<4x32xf32>
      tpu.vector_store %arg5[%c0_24, %c0_25], %50 {strides = array<i32>} : memref<4x32xf32, #tpu.memory_space<vmem>>, vector<4x32xf32>,
      %cst_26 = arith.constant 0.000000e+00 : f32
      %52 = vector.broadcast %cst_26 : f32 to vector<4x32xf32>
      %c0_27 = arith.constant 0 : index
      %c0_28 = arith.constant 0 : index
      %53 = vector.load %arg6[%c0_27, %c0_28] : memref<4x32xf32, #tpu.memory_space<vmem>>, vector<4x32xf32>
      tpu.vector_store %arg6[%c0_27, %c0_28], %52 {strides = array<i32>} : memref<4x32xf32, #tpu.memory_space<vmem>>, vector<4x32xf32>,
    } else {
    }
    %c0 = arith.constant 0 : index
    %c0_1 = arith.constant 0 : index
    %3 = vector.load %arg5[%c0, %c0_1] : memref<4x32xf32, #tpu.memory_space<vmem>>, vector<4x32xf32>
    %c0_2 = arith.constant 0 : index
    %c0_3 = arith.constant 0 : index
    %4 = vector.load %arg3[%c0_2, %c0_3] : memref<32x256xf32, #tpu.memory_space<vmem>>, vector<32x256xf32>
    %cst = arith.constant dense<0.000000e+00> : vector<4x256xf32>
    %5 = tpu.matmul %3, %4, %cst {dimension_numbers = #tpu.dot_dimension_numbers<[1], [0], [0], [1], [0, 0, 1, 1], [], []>} : vector<4x32xf32>, vector<32x256xf32>, vector<4x256xf32> -> vector<4x256xf32>
    %c0_4 = arith.constant 0 : index
    %c0_5 = arith.constant 0 : index
    %c0_6 = arith.constant 0 : index
    %6 = vector.load %arg1[%c0_4, %c0_5, %c0_6] : memref<1x2x256xf32, #tpu.memory_space<vmem>>, vector<1x2x256xf32>
    %7 = vector.shape_cast %6 : vector<1x2x256xf32> to vector<2x256xf32>
    %8 = vector.extract_strided_slice %7 {offsets = [0, 0], sizes = [2, 128], strides = [1, 1]} : vector<2x256xf32> to vector<2x128xf32>
    %c0_7 = arith.constant 0 : index
    %c0_8 = arith.constant 0 : index
    %c0_9 = arith.constant 0 : index
    %9 = vector.load %arg2[%c0_7, %c0_8, %c0_9] : memref<1x2x256xf32, #tpu.memory_space<vmem>>, vector<1x2x256xf32>
    %10 = vector.shape_cast %9 : vector<1x2x256xf32> to vector<2x256xf32>
    %11 = vector.extract_strided_slice %10 {offsets = [0, 128], sizes = [2, 128], strides = [1, 1]} : vector<2x256xf32> to vector<2x128xf32>
    %12 = vector.extract_strided_slice %5 {offsets = [0, 0], sizes = [2, 128], strides = [1, 1]} : vector<4x256xf32> to vector<2x128xf32>
    %13 = arith.addf %8, %12 : vector<2x128xf32>
    %14 = vector.extract_strided_slice %5 {offsets = [2, 128], sizes = [2, 128], strides = [1, 1]} : vector<4x256xf32> to vector<2x128xf32>
    %15 = arith.addf %11, %14 : vector<2x128xf32>
    %16 = tpu.concatenate %13, %15 in 0 : vector<2x128xf32>, vector<2x128xf32> -> vector<4x128xf32>
    %17 = vector.extract_strided_slice %16 {offsets = [0, 0], sizes = [4, 96], strides = [1, 1]} : vector<4x128xf32> to vector<4x96xf32>
    %18 = arith.negf %17 : vector<4x96xf32>
    %19 = math.exp %18 : vector<4x96xf32>
    %cst_10 = arith.constant 1.000000e+00 : f32
    %20 = vector.broadcast %cst_10 : f32 to vector<4x96xf32>
    %21 = arith.addf %20, %19 : vector<4x96xf32>
    %22 = arith.divf %20, %21 : vector<4x96xf32>
    %23 = vector.extract_strided_slice %22 {offsets = [0, 0], sizes = [4, 32], strides = [1, 1]} : vector<4x96xf32> to vector<4x32xf32>
    %24 = vector.extract_strided_slice %22 {offsets = [0, 32], sizes = [4, 32], strides = [1, 1]} : vector<4x96xf32> to vector<4x32xf32>
    %25 = vector.extract_strided_slice %22 {offsets = [0, 64], sizes = [4, 32], strides = [1, 1]} : vector<4x96xf32> to vector<4x32xf32>
    %26 = vector.extract_strided_slice %16 {offsets = [0, 96], sizes = [4, 32], strides = [1, 1]} : vector<4x128xf32> to vector<4x32xf32>
    %27 = math.tanh %26 : vector<4x32xf32>
    %c0_11 = arith.constant 0 : index
    %c0_12 = arith.constant 0 : index
    %28 = vector.load %arg6[%c0_11, %c0_12] : memref<4x32xf32, #tpu.memory_space<vmem>>, vector<4x32xf32>
    %29 = arith.mulf %24, %28 : vector<4x32xf32>
    %30 = arith.mulf %23, %27 : vector<4x32xf32>
    %31 = arith.addf %29, %30 : vector<4x32xf32>
    %32 = math.tanh %31 : vector<4x32xf32>
    %33 = arith.mulf %25, %32 : vector<4x32xf32>
    %c0_13 = arith.constant 0 : index
    %c0_14 = arith.constant 0 : index
    %34 = vector.load %arg6[%c0_13, %c0_14] : memref<4x32xf32, #tpu.memory_space<vmem>>, vector<4x32xf32>
    tpu.vector_store %arg6[%c0_13, %c0_14], %31 {strides = array<i32>} : memref<4x32xf32, #tpu.memory_space<vmem>>, vector<4x32xf32>,
    %c0_15 = arith.constant 0 : index
    %c0_16 = arith.constant 0 : index
    %35 = vector.load %arg5[%c0_15, %c0_16] : memref<4x32xf32, #tpu.memory_space<vmem>>, vector<4x32xf32>
    tpu.vector_store %arg5[%c0_15, %c0_16], %33 {strides = array<i32>} : memref<4x32xf32, #tpu.memory_space<vmem>>, vector<4x32xf32>,
    %36 = vector.extract_strided_slice %33 {offsets = [0, 0], sizes = [2, 32], strides = [1, 1]} : vector<4x32xf32> to vector<2x32xf32>
    %37 = arith.index_cast %arg0 : i32 to index
    %c0_17 = arith.constant 0 : index
    %c0_18 = arith.constant 0 : index
    %38 = vector.load %arg7[%37, %c0_17, %c0_18] : memref<8x2x32xf32, #tpu.memory_space<vmem>>, vector<1x2x32xf32>
    %39 = vector.shape_cast %38 : vector<1x2x32xf32> to vector<2x32xf32>
    %40 = vector.shape_cast %36 : vector<2x32xf32> to vector<1x2x32xf32>
    tpu.vector_store %arg7[%37, %c0_17, %c0_18], %40 {strides = array<i32>} : memref<8x2x32xf32, #tpu.memory_space<vmem>>, vector<1x2x32xf32>,
    %41 = vector.extract_strided_slice %33 {offsets = [2, 0], sizes = [2, 32], strides = [1, 1]} : vector<4x32xf32> to vector<2x32xf32>
    %c7_i32 = arith.constant 7 : i32
    %42 = arith.subi %c7_i32, %arg0 : i32
    %43 = arith.index_cast %42 : i32 to index
    %c0_19 = arith.constant 0 : index
    %c0_20 = arith.constant 0 : index
    %44 = vector.load %arg8[%43, %c0_19, %c0_20] : memref<8x2x32xf32, #tpu.memory_space<vmem>>, vector<1x2x32xf32>
    %45 = vector.shape_cast %44 : vector<1x2x32xf32> to vector<2x32xf32>
    %46 = vector.shape_cast %41 : vector<2x32xf32> to vector<1x2x32xf32>
    tpu.vector_store %arg8[%43, %c0_19, %c0_20], %46 {strides = array<i32>} : memref<8x2x32xf32, #tpu.memory_space<vmem>>, vector<1x2x32xf32>,
    %c7_i32_21 = arith.constant 7 : i32
    %47 = arith.cmpi eq, %arg0, %c7_i32_21 : i32
    %48 = arith.extui %47 : i1 to i32
    %c0_i32_22 = arith.constant 0 : i32
    %49 = arith.cmpi ne, %48, %c0_i32_22 : i32
    scf.if %49 {
      %c0_23 = arith.constant 0 : index
      %c0_24 = arith.constant 0 : index
      %c0_25 = arith.constant 0 : index
      %50 = vector.load %arg7[%c0_23, %c0_24, %c0_25] : memref<8x2x32xf32, #tpu.memory_space<vmem>>, vector<8x2x32xf32>
      %c0_26 = arith.constant 0 : index
      %c0_27 = arith.constant 0 : index
      %c0_28 = arith.constant 0 : index
      %51 = vector.load %arg4[%c0_26, %c0_27, %c0_28] : memref<8x2x64xf32, #tpu.memory_space<vmem>>, vector<8x2x32xf32>
      tpu.vector_store %arg4[%c0_26, %c0_27, %c0_28], %50 {strides = array<i32>} : memref<8x2x64xf32, #tpu.memory_space<vmem>>, vector<8x2x32xf32>,
      %c0_29 = arith.constant 0 : index
      %c0_30 = arith.constant 0 : index
      %c0_31 = arith.constant 0 : index
      %52 = vector.load %arg8[%c0_29, %c0_30, %c0_31] : memref<8x2x32xf32, #tpu.memory_space<vmem>>, vector<8x2x32xf32>
      %c0_32 = arith.constant 0 : index
      %c0_33 = arith.constant 0 : index
      %c32 = arith.constant 32 : index
      %53 = vector.load %arg4[%c0_32, %c0_33, %c32] : memref<8x2x64xf32, #tpu.memory_space<vmem>>, vector<8x2x32xf32>
      tpu.vector_store %arg4[%c0_32, %c0_33, %c32], %52 {strides = array<i32>} : memref<8x2x64xf32, #tpu.memory_space<vmem>>, vector<8x2x32xf32>,
    } else {
    }
    return
  }
  func.func @transform_0(%arg0: i32) -> (i32, i32, i32) {
    %c0_i32 = arith.constant 0 : i32
    %c0_i32_0 = arith.constant 0 : i32
    %c0_i32_1 = arith.constant 0 : i32
    return %arg0, %c0_i32, %c0_i32_0 : i32, i32, i32
  }
  func.func @transform_1(%arg0: i32) -> (i32, i32, i32) {
    %c7_i32 = arith.constant 7 : i32
    %0 = arith.subi %c7_i32, %arg0 : i32
    %c0_i32 = arith.constant 0 : i32
    %c0_i32_0 = arith.constant 0 : i32
    %c0_i32_1 = arith.constant 0 : i32
    return %0, %c0_i32, %c0_i32_0 : i32, i32, i32
  }
  func.func @transform_2(%arg0: i32) -> (i32, i32) {
    %c0_i32 = arith.constant 0 : i32
    %c0_i32_0 = arith.constant 0 : i32
    %c0_i32_1 = arith.constant 0 : i32
    return %c0_i32, %c0_i32_0 : i32, i32
  }
  func.func @transform_3(%arg0: i32) -> (i32, i32, i32) {
    %c0_i32 = arith.constant 0 : i32
    %c0_i32_0 = arith.constant 0 : i32
    %c0_i32_1 = arith.constant 0 : i32
    %c0_i32_2 = arith.constant 0 : i32
    return %c0_i32, %c0_i32_0, %c0_i32_1 : i32, i32, i32
  }
}

module attributes {stable_mosaic.version = 11 : i64} {
  func.func @_bilstm_kernel(%arg0: i32, %arg1: memref<1x2x256xf32, #tpu.memory_space<vmem>>, %arg2: memref<1x2x256xf32, #tpu.memory_space<vmem>>, %arg3: memref<32x256xf32, #tpu.memory_space<vmem>>, %arg4: memref<8x2x1xf32, #tpu.memory_space<vmem>>, %arg5: memref<8x2x64xf32, #tpu.memory_space<vmem>>, %arg6: memref<4x32xf32, #tpu.memory_space<vmem>>, %arg7: memref<4x32xf32, #tpu.memory_space<vmem>>, %arg8: memref<8x2x32xf32, #tpu.memory_space<vmem>>, %arg9: memref<8x2x32xf32, #tpu.memory_space<vmem>>) attributes {dimension_semantics = [#tpu.dimension_semantics<arbitrary>], iteration_bounds = array<i64: 8>, scalar_prefetch = 0 : i64, scratch_operands = 4 : i64, tpu.core_type = #tpu.core_type<tc>, window_params = [{transform_indices = @transform_0, window_bounds = array<i64: 1, 2, 256>}, {transform_indices = @transform_1, window_bounds = array<i64: 1, 2, 256>}, {pipeline_mode = #tpu.pipeline_mode<synchronous>, transform_indices = @transform_2, window_bounds = array<i64: 32, 256>}, {pipeline_mode = #tpu.pipeline_mode<synchronous>, transform_indices = @transform_3, window_bounds = array<i64: 8, 2, 1>}, {pipeline_mode = #tpu.pipeline_mode<synchronous>, transform_indices = @transform_4, window_bounds = array<i64: 8, 2, 64>}]} {
    %c0_i32 = arith.constant 0 : i32
    %0 = arith.cmpi eq, %arg0, %c0_i32 : i32
    %1 = arith.extui %0 : i1 to i32
    %c0_i32_0 = arith.constant 0 : i32
    %2 = arith.cmpi ne, %1, %c0_i32_0 : i32
    scf.if %2 {
      %cst_23 = arith.constant 0.000000e+00 : f32
      %50 = vector.broadcast %cst_23 : f32 to vector<4x32xf32>
      %c0_24 = arith.constant 0 : index
      %c0_25 = arith.constant 0 : index
      %51 = vector.load %arg6[%c0_24, %c0_25] : memref<4x32xf32, #tpu.memory_space<vmem>>, vector<4x32xf32>
      tpu.vector_store %arg6[%c0_24, %c0_25], %50 {strides = array<i32>} : memref<4x32xf32, #tpu.memory_space<vmem>>, vector<4x32xf32>,
      %cst_26 = arith.constant 0.000000e+00 : f32
      %52 = vector.broadcast %cst_26 : f32 to vector<4x32xf32>
      %c0_27 = arith.constant 0 : index
      %c0_28 = arith.constant 0 : index
      %53 = vector.load %arg7[%c0_27, %c0_28] : memref<4x32xf32, #tpu.memory_space<vmem>>, vector<4x32xf32>
      tpu.vector_store %arg7[%c0_27, %c0_28], %52 {strides = array<i32>} : memref<4x32xf32, #tpu.memory_space<vmem>>, vector<4x32xf32>,
    } else {
    }
    %c0 = arith.constant 0 : index
    %c0_1 = arith.constant 0 : index
    %3 = vector.load %arg6[%c0, %c0_1] : memref<4x32xf32, #tpu.memory_space<vmem>>, vector<4x32xf32>
    %c0_2 = arith.constant 0 : index
    %c0_3 = arith.constant 0 : index
    %4 = vector.load %arg3[%c0_2, %c0_3] : memref<32x256xf32, #tpu.memory_space<vmem>>, vector<32x256xf32>
    %cst = arith.constant dense<0.000000e+00> : vector<4x256xf32>
    %5 = tpu.matmul %3, %4, %cst {dimension_numbers = #tpu.dot_dimension_numbers<[1], [0], [0], [1], [0, 0, 1, 1], [], []>} : vector<4x32xf32>, vector<32x256xf32>, vector<4x256xf32> -> vector<4x256xf32>
    %c0_4 = arith.constant 0 : index
    %c0_5 = arith.constant 0 : index
    %c0_6 = arith.constant 0 : index
    %6 = vector.load %arg1[%c0_4, %c0_5, %c0_6] : memref<1x2x256xf32, #tpu.memory_space<vmem>>, vector<1x2x256xf32>
    %7 = vector.shape_cast %6 : vector<1x2x256xf32> to vector<2x256xf32>
    %8 = vector.extract_strided_slice %7 {offsets = [0, 0], sizes = [2, 128], strides = [1, 1]} : vector<2x256xf32> to vector<2x128xf32>
    %c0_7 = arith.constant 0 : index
    %c0_8 = arith.constant 0 : index
    %c0_9 = arith.constant 0 : index
    %9 = vector.load %arg2[%c0_7, %c0_8, %c0_9] : memref<1x2x256xf32, #tpu.memory_space<vmem>>, vector<1x2x256xf32>
    %10 = vector.shape_cast %9 : vector<1x2x256xf32> to vector<2x256xf32>
    %11 = vector.extract_strided_slice %10 {offsets = [0, 128], sizes = [2, 128], strides = [1, 1]} : vector<2x256xf32> to vector<2x128xf32>
    %12 = vector.extract_strided_slice %5 {offsets = [0, 0], sizes = [2, 128], strides = [1, 1]} : vector<4x256xf32> to vector<2x128xf32>
    %13 = arith.addf %8, %12 : vector<2x128xf32>
    %14 = vector.extract_strided_slice %5 {offsets = [2, 128], sizes = [2, 128], strides = [1, 1]} : vector<4x256xf32> to vector<2x128xf32>
    %15 = arith.addf %11, %14 : vector<2x128xf32>
    %16 = tpu.concatenate %13, %15 in 0 : vector<2x128xf32>, vector<2x128xf32> -> vector<4x128xf32>
    %17 = vector.extract_strided_slice %16 {offsets = [0, 0], sizes = [4, 96], strides = [1, 1]} : vector<4x128xf32> to vector<4x96xf32>
    %18 = arith.negf %17 : vector<4x96xf32>
    %19 = math.exp %18 : vector<4x96xf32>
    %cst_10 = arith.constant 1.000000e+00 : f32
    %20 = vector.broadcast %cst_10 : f32 to vector<4x96xf32>
    %21 = arith.addf %20, %19 : vector<4x96xf32>
    %22 = arith.divf %20, %21 : vector<4x96xf32>
    %23 = vector.extract_strided_slice %22 {offsets = [0, 0], sizes = [4, 32], strides = [1, 1]} : vector<4x96xf32> to vector<4x32xf32>
    %24 = vector.extract_strided_slice %22 {offsets = [0, 32], sizes = [4, 32], strides = [1, 1]} : vector<4x96xf32> to vector<4x32xf32>
    %25 = vector.extract_strided_slice %22 {offsets = [0, 64], sizes = [4, 32], strides = [1, 1]} : vector<4x96xf32> to vector<4x32xf32>
    %26 = vector.extract_strided_slice %16 {offsets = [0, 96], sizes = [4, 32], strides = [1, 1]} : vector<4x128xf32> to vector<4x32xf32>
    %27 = math.tanh %26 : vector<4x32xf32>
    %c0_11 = arith.constant 0 : index
    %c0_12 = arith.constant 0 : index
    %28 = vector.load %arg7[%c0_11, %c0_12] : memref<4x32xf32, #tpu.memory_space<vmem>>, vector<4x32xf32>
    %29 = arith.mulf %24, %28 : vector<4x32xf32>
    %30 = arith.mulf %23, %27 : vector<4x32xf32>
    %31 = arith.addf %29, %30 : vector<4x32xf32>
    %32 = math.tanh %31 : vector<4x32xf32>
    %33 = arith.mulf %25, %32 : vector<4x32xf32>
    %c0_13 = arith.constant 0 : index
    %c0_14 = arith.constant 0 : index
    %34 = vector.load %arg7[%c0_13, %c0_14] : memref<4x32xf32, #tpu.memory_space<vmem>>, vector<4x32xf32>
    tpu.vector_store %arg7[%c0_13, %c0_14], %31 {strides = array<i32>} : memref<4x32xf32, #tpu.memory_space<vmem>>, vector<4x32xf32>,
    %c0_15 = arith.constant 0 : index
    %c0_16 = arith.constant 0 : index
    %35 = vector.load %arg6[%c0_15, %c0_16] : memref<4x32xf32, #tpu.memory_space<vmem>>, vector<4x32xf32>
    tpu.vector_store %arg6[%c0_15, %c0_16], %33 {strides = array<i32>} : memref<4x32xf32, #tpu.memory_space<vmem>>, vector<4x32xf32>,
    %36 = vector.extract_strided_slice %33 {offsets = [0, 0], sizes = [2, 32], strides = [1, 1]} : vector<4x32xf32> to vector<2x32xf32>
    %37 = arith.index_cast %arg0 : i32 to index
    %c0_17 = arith.constant 0 : index
    %c0_18 = arith.constant 0 : index
    %38 = vector.load %arg8[%37, %c0_17, %c0_18] : memref<8x2x32xf32, #tpu.memory_space<vmem>>, vector<1x2x32xf32>
    %39 = vector.shape_cast %38 : vector<1x2x32xf32> to vector<2x32xf32>
    %40 = vector.shape_cast %36 : vector<2x32xf32> to vector<1x2x32xf32>
    tpu.vector_store %arg8[%37, %c0_17, %c0_18], %40 {strides = array<i32>} : memref<8x2x32xf32, #tpu.memory_space<vmem>>, vector<1x2x32xf32>,
    %41 = vector.extract_strided_slice %33 {offsets = [2, 0], sizes = [2, 32], strides = [1, 1]} : vector<4x32xf32> to vector<2x32xf32>
    %c7_i32 = arith.constant 7 : i32
    %42 = arith.subi %c7_i32, %arg0 : i32
    %43 = arith.index_cast %42 : i32 to index
    %c0_19 = arith.constant 0 : index
    %c0_20 = arith.constant 0 : index
    %44 = vector.load %arg9[%43, %c0_19, %c0_20] : memref<8x2x32xf32, #tpu.memory_space<vmem>>, vector<1x2x32xf32>
    %45 = vector.shape_cast %44 : vector<1x2x32xf32> to vector<2x32xf32>
    %46 = vector.shape_cast %41 : vector<2x32xf32> to vector<1x2x32xf32>
    tpu.vector_store %arg9[%43, %c0_19, %c0_20], %46 {strides = array<i32>} : memref<8x2x32xf32, #tpu.memory_space<vmem>>, vector<1x2x32xf32>,
    %c7_i32_21 = arith.constant 7 : i32
    %47 = arith.cmpi eq, %arg0, %c7_i32_21 : i32
    %48 = arith.extui %47 : i1 to i32
    %c0_i32_22 = arith.constant 0 : i32
    %49 = arith.cmpi ne, %48, %c0_i32_22 : i32
    scf.if %49 {
      %c0_23 = arith.constant 0 : index
      %c0_24 = arith.constant 0 : index
      %c0_25 = arith.constant 0 : index
      %50 = vector.load %arg4[%c0_23, %c0_24, %c0_25] : memref<8x2x1xf32, #tpu.memory_space<vmem>>, vector<8x2x1xf32>
      %c0_26 = arith.constant 0 : index
      %c0_27 = arith.constant 0 : index
      %c0_28 = arith.constant 0 : index
      %51 = vector.load %arg8[%c0_26, %c0_27, %c0_28] : memref<8x2x32xf32, #tpu.memory_space<vmem>>, vector<8x2x32xf32>
      %52 = vector.broadcast %50 : vector<8x2x1xf32> to vector<8x2x32xf32>
      %53 = arith.mulf %51, %52 : vector<8x2x32xf32>
      %c0_29 = arith.constant 0 : index
      %c0_30 = arith.constant 0 : index
      %c0_31 = arith.constant 0 : index
      %54 = vector.load %arg5[%c0_29, %c0_30, %c0_31] : memref<8x2x64xf32, #tpu.memory_space<vmem>>, vector<8x2x32xf32>
      tpu.vector_store %arg5[%c0_29, %c0_30, %c0_31], %53 {strides = array<i32>} : memref<8x2x64xf32, #tpu.memory_space<vmem>>, vector<8x2x32xf32>,
      %c0_32 = arith.constant 0 : index
      %c0_33 = arith.constant 0 : index
      %c0_34 = arith.constant 0 : index
      %55 = vector.load %arg9[%c0_32, %c0_33, %c0_34] : memref<8x2x32xf32, #tpu.memory_space<vmem>>, vector<8x2x32xf32>
      %56 = vector.broadcast %50 : vector<8x2x1xf32> to vector<8x2x32xf32>
      %57 = arith.mulf %55, %56 : vector<8x2x32xf32>
      %c0_35 = arith.constant 0 : index
      %c0_36 = arith.constant 0 : index
      %c32 = arith.constant 32 : index
      %58 = vector.load %arg5[%c0_35, %c0_36, %c32] : memref<8x2x64xf32, #tpu.memory_space<vmem>>, vector<8x2x32xf32>
      tpu.vector_store %arg5[%c0_35, %c0_36, %c32], %57 {strides = array<i32>} : memref<8x2x64xf32, #tpu.memory_space<vmem>>, vector<8x2x32xf32>,
    } else {
    }
    return
  }
  func.func @transform_0(%arg0: i32) -> (i32, i32, i32) {
    %c0_i32 = arith.constant 0 : i32
    %c0_i32_0 = arith.constant 0 : i32
    %c0_i32_1 = arith.constant 0 : i32
    return %arg0, %c0_i32, %c0_i32_0 : i32, i32, i32
  }
  func.func @transform_1(%arg0: i32) -> (i32, i32, i32) {
    %c7_i32 = arith.constant 7 : i32
    %0 = arith.subi %c7_i32, %arg0 : i32
    %c0_i32 = arith.constant 0 : i32
    %c0_i32_0 = arith.constant 0 : i32
    %c0_i32_1 = arith.constant 0 : i32
    return %0, %c0_i32, %c0_i32_0 : i32, i32, i32
  }
  func.func @transform_2(%arg0: i32) -> (i32, i32) {
    %c0_i32 = arith.constant 0 : i32
    %c0_i32_0 = arith.constant 0 : i32
    %c0_i32_1 = arith.constant 0 : i32
    return %c0_i32, %c0_i32_0 : i32, i32
  }
  func.func @transform_3(%arg0: i32) -> (i32, i32, i32) {
    %c0_i32 = arith.constant 0 : i32
    %c0_i32_0 = arith.constant 0 : i32
    %c0_i32_1 = arith.constant 0 : i32
    %c0_i32_2 = arith.constant 0 : i32
    return %c0_i32, %c0_i32_0, %c0_i32_1 : i32, i32, i32
  }
  func.func @transform_4(%arg0: i32) -> (i32, i32, i32) {
    %c0_i32 = arith.constant 0 : i32
    %c0_i32_0 = arith.constant 0 : i32
    %c0_i32_1 = arith.constant 0 : i32
    %c0_i32_2 = arith.constant 0 : i32
    return %c0_i32, %c0_i32_0, %c0_i32_1 : i32, i32, i32
  }
}

</mosaic_0001>

<bundles_post_ra>
// kernel: sent_encoder_forward.2
= control target key start
LH: loop header
LB: loop body
LE: loop exit
PB: predicated region body
PF: predicated region fallthrough
CT: control target
= control target key end

     0   :  { %s510_s12 = smov 0   ;;  %s636_s0 = inlined_call_operand.vmem [shape: f32[8,2,256], index: 0, kind: input, shape index: {}, may-alias: {0,1}]   ;;  %s637_s1 = inlined_call_operand.vmem [shape: f32[8,2,256], index: 1, kind: input, shape index: {}, may-alias: {0,1}]   ;;  %s638_s2 = inlined_call_operand.vmem [shape: f32[32,256], index: 2, kind: input, shape index: {}]   ;;  %s639_s3 = inlined_call_operand.vmem [shape: f32[8,2,64], index: 3, kind: output, shape index: {}]  }
   0x1 LB: > { %s516_s13 = sadd.s32 4294967295, %s483_s12   ;;  %p440_p0 = scmp.ge.s32.totalorder %s483_s12, 1  ;;  %s483_s12 = sphi %s510_s12, %s13_s12  }
   0x2   : > { %p146_p1 = scmp.lt.s32.totalorder %s483_s12, 9 }
   0x4   : > { %p147_p2 = pnand %p440_p0, %p146_p1 }
   0x5   : > { %p171_p3 = scmp.lt.s32.totalorder (!%p147_p2), %s516_s13, 7  ;;  %s522_s14 = ssub.s32 (!%p147_p2), 7, %s516_s13 }
   0x6   : > { %150 = sbr.rel (%p147_p2) target bundleno = 773 (0x305), region = 32  ;;  %p177_p4 = scmp.lt.s32.totalorder (!%p147_p2), %s522_s14, 7 }
   0x7   : > { %p445_p5 = scmp.ne.s32.totalorder (!%p147_p2), %s516_s13, 0 }
   0xb   : > { %s172_s15 = scalar_select %p171_p3, %s516_s13, 7 }
   0xc   : > { %s178_s16 = scalar_select %p177_p4, %s522_s14, 7 }
   0xd   : > { %s454_s17 = sshll.u32 %s172_s15, 2  ;;  %186 = sbr.rel (%p445_p5) target bundleno = 21 (0x15), region = 36 }
   0xe   : > { %s530_s20 = scalar_lea.vmem %s636_s0, %s454_s17  ;;  %s455_s21 = sshll.u32 %s178_s16, 2 }
   0xf   : > { %s181_s24 = scalar_lea.vmem %s637_s1, %s455_s21 }
  0x12   : > { %vm187_vm0 = vcmask 257024   ;;  %v485_v0 = vmov 0.0  }
  0x13   : > { %188 = vst.msk [vmem:[#allocation2] sm:$0xf] %vm187_vm0, %v485_v0 }
  0x14   : > { %189 = vst.msk [vmem:[#allocation3] sm:$0xf] %vm187_vm0, %v485_v0 }
  0x15 PF: > { %v198_v1 = vld [vmem:[%s638_s2 + $0x38] sm:$0xff]  ;;  %v196_v2 = vld [vmem:[%s638_s2 + $0x28] sm:$0xff]  ;;  %v197_v3 = vld [vmem:[%s638_s2 + $0x30] sm:$0xff]  ;;  %vm199_vm1 = vcmask 261120   ;;  %vm260_vm2 = vcmask 1041408   ;;  %s486_s17 = smov 32  }
  0x16   : > { %235 = vmatpush.msra.mxu1 %v198_v1  ;;  %v194_v4 = vld [vmem:[%s638_s2 + $0x18] sm:$0xff]  ;;  %215 = vmatpush.msra.mxu0 %v197_v3  ;;  %v195_v5 = vld [vmem:[%s638_s2 + $0x20] sm:$0xff]  ;;  %v193_v6 = vld [vmem:[%s638_s2 + $0x10] sm:$0xff]  ;;  %s487_s18 = smov 96   ;;  %vm308_vm7 = vcmask 257024   ;;  %s488_s19 = smov 64  }
  0x17   : > { %v192_v7 = vld [vmem:[%s638_s2 + $0x8] sm:$0xff]  ;;  %v191_v9 = vld [vmem:[%s638_s2] sm:$0xff]  ;;  %s450_s21 = sshll.u32 %s522_s14, 1  ;;  %vm317_vm8 = vcmask 254976   ;;  %vm322_vm9 = vcmask 257026   ;;  %p451_p6 = scmp.ne.s32.totalorder %s516_s13, 7 }
  0x18   : > { %236 = vmatpush.msra.mxu1 %v196_v2  ;;  %216 = vmatpush.msra.mxu0 %v195_v5  ;;  %v244_v11 = vld [vmem:[%s181_s24] sm:$0xf]  ;;  %s321_s23 = scalar_lea.vmem [#allocation5], %s450_s21  ;;  %s489_s24 = smov (!%p451_p6), 32  }
  0x19   : > { %v247_v12 = vrot.slane %v244_v11, 2  ;;  %v243_v16 = vld [vmem:[%s530_s20] sm:$0xf]  ;;  %s449_s20 = sshll.u32 %s516_s13, 1 }
  0x1a   : > { %237 = vmatpush.msra.mxu1 %v194_v4  ;;  %v190_v8 = vld [vmem:[#allocation2] sm:$0xf]  ;;  %217 = vmatpush.msra.mxu0 %v193_v6  ;;  %s316_s22 = scalar_lea.vmem [#allocation4], %s449_s20 }
  0x1b   : > { %v282_v21 = vld [vmem:[#allocation3] sm:$0xf] }
  0x1c   : > { %238 = vmatpush.msra.mxu1 %v192_v7  ;;  %218 = vmatpush.msra.mxu0 %v191_v9 }
  0x1d   : > { %447 = vmatmul.msk.f32.vlgmr.msra.gmra.mxu1 %vm199_vm1, %v190_v8  ;;  %446 = vmatmul.msk.f32.vlgmr.msra.gmra.mxu0 %vm199_vm1, %v190_v8 }
  0x9a   : > { %v240_v10 = vpop.f32.mrf.mxu1  ;;  %v220_v15 = vpop.f32.mrf.mxu0 }
  0x9b   : > { %250 = vst.sshfl [vmem:[#allocation1] sm:$0xff pattern:$0x73625140] %v240_v10  ;;  %v245_v17 = vadd.f32 %v243_v16, %v220_v15 }
  0xa2   : > { %v252_v13 = vld [vmem:[#allocation1 + $0x1] ss:$4 sm:$0xff] }
  0xa3   : > { %v254_v14 = vadd.f32 %v252_v13, %v247_v12 }
  0xa5   : > { %257 = vst [vmem:[#allocation1 + $0x1] ss:$4 sm:$0xff] %v254_v14 }
  0xac   : > { %v258_v18 = vld.sshfl [vmem:[#allocation1] sm:$0xff pattern:$0x73625140] }
  0xad   : > { %v261_v19 = vsel %vm260_vm2, %v245_v17, %v258_v18 }
  0xae   : > { %469 = vtanh.f32 %v261_v19  ;;  %v448_v22 = vmul.f32 -1.442695, %v261_v19 }
  0xb0   : > { %471 = vpow2.f32 %v448_v22 }
  0xb4   : > { %v470_v20 = vpop.eup %469 }
  0xb5   : > { %289 = vrot.lane.b32.xlu0 %v470_v20, %s486_s17 }
  0xb6   : > { %v472_v23 = vpop.eup %471 }
  0xb7   : > { %v265_v24 = vadd.f32 1.0, %v472_v23 }
  0xb9   : > { %473 = vrcp.f32 %v265_v24  ;;  %v277_v30 = vand.u32 2147483648, %v265_v24  ;;  %vm271_vm4 = vweird.f32 %v265_v24  ;;  %v275_v31 = vand.u32 2147483647, %v265_v24 }
  0xbb   : > { %v278_v33 = vor.u32 1.1754944e-38, %v277_v30  ;;  %vm276_vm6 = vcmp.eq.f32.partialorder %v275_v31, 8.507059e+37 }
  0xbd   : > { %284 = vrot.lane.b32.xlu0 %v282_v21, %s486_s17 }
  0xbf   : > { %v474_v25 = vpop.eup %473 }
  0xc0   : > { %v267_v26 = vmul.f32 %v474_v25, %v265_v24  ;;  %vm272_vm3 = vweird.f32 %v474_v25 }
  0xc1   : > { %vm273_vm5 = vmor %vm271_vm4, %vm272_vm3 }
  0xc2   : > { %v268_v27 = vsub.f32 1.0, %v267_v26 }
  0xc4   : > { %v269_v28 = vmul.f32 %v474_v25, %v268_v27 }
  0xc6   : > { %v270_v29 = vadd.f32 %v474_v25, %v269_v28 }
  0xc8   : > { %v274_v32 = vsel %vm273_vm5, %v474_v25, %v270_v29 }
  0xc9   : > { %v279_v35 = vsel %vm276_vm6, %v278_v33, %v274_v32 }
 0x127   : > { %v290_v34 = vpop.permute.xlu0 %289 }
 0x128   : > { %v292_v36 = vmul.f32 %v290_v34, %v279_v35 }
 0x12a   : > { %294 = vrot.lane.b32.xlu1 %v292_v36, %s486_s17 }
 0x12f   : > { %v285_v37 = vpop.permute.xlu0 %284 }
 0x130   : > { %v287_v38 = vmul.f32 %v285_v37, %v279_v35 }
 0x19c   : > { %v295_v39 = vpop.permute.xlu1 %294 }
 0x19d   : > { %v297_v40 = vadd.f32 %v295_v39, %v287_v38 }
 0x19f   : > { %475 = vtanh.f32 %v297_v40  ;;  %305 = vrot.lane.b32.xlu2 %v297_v40, %s487_s18 }
 0x1a5   : > { %v476_v41 = vpop.eup %475 }
 0x1a6   : > { %300 = vrot.lane.b32.xlu1 %v476_v41, %s486_s17 }
 0x1f9   : > { %v306_v42 = vpop.permute.xlu2 %305 }
 0x1fa   : > { %309 = vst.msk [vmem:[#allocation3] sm:$0xf] %vm308_vm7, %v306_v42 }
 0x218   : > { %v301_v43 = vpop.permute.xlu1 %300 }
 0x219   : > { %v303_v44 = vmul.f32 %v301_v43, %v279_v35 }
 0x21b   : > { %311 = vrot.lane.b32.xlu2 %v303_v44, %s488_s19 }
 0x274   : > { %327 = sbr.rel (%p451_p6) target bundleno = 773 (0x305), region = 40 }
 0x275   : > { %v312_v45 = vpop.permute.xlu2 %311 }
 0x276   : > { %314 = vst.msk [vmem:[#allocation2] sm:$0xf] %vm308_vm7, %v312_v45 }
 0x277   : > { %318 = vst.msk [vmem:[%s316_s22] sm:$0x3] %vm317_vm8, %v312_v45 }
 0x278   : > { %323 = vst.msk [vmem:[%s321_s23 - $0x2] sm:$0xc] %vm322_vm9, %v312_v45 }
 0x279   : > { %vm384_vm10 = vcmask 517376  }
 0x27e   : > { %v330_v54 = vld [vmem:[#allocation4 + $0x4] sm:$0x3]  ;;  %v328_v55 = vld [vmem:[#allocation4] sm:$0x3]  ;;  %v332_v56 = vld [vmem:[#allocation4 + $0x8] sm:$0x3] }
 0x27f   : > { %v346_v46 = vld [vmem:[#allocation5 + $0x4] sm:$0x3]  ;;  %v344_v47 = vld [vmem:[#allocation5] sm:$0x3]  ;;  %v348_v48 = vld [vmem:[#allocation5 + $0x8] sm:$0x3] }
 0x280   : > { %364 = vrot.lane.b32.xlu1 %v346_v46, %s489_s24  ;;  %360 = vrot.lane.b32.xlu0 %v344_v47, %s489_s24  ;;  %v347_v49 = vld [vmem:[#allocation5 + $0x6] sm:$0x3]  ;;  %v345_v50 = vld [vmem:[#allocation5 + $0x2] sm:$0x3]  ;;  %v349_v51 = vld [vmem:[#allocation5 + $0xa] sm:$0x3] }
 0x281   : > { %368 = vrot.lane.b32.xlu2 %v348_v48, %s489_s24  ;;  %v351_v52 = vld [vmem:[#allocation5 + $0xe] sm:$0x3]  ;;  %v350_v53 = vld [vmem:[#allocation5 + $0xc] sm:$0x3]  ;;  %338 = vst.msk [vmem:[%s639_s3 + $0x4] sm:$0x3] %vm317_vm8, %v330_v54 }
 0x282   : > { %336 = vst.msk [vmem:[%s639_s3] sm:$0x3] %vm317_vm8, %v328_v55  ;;  %v331_v57 = vld [vmem:[#allocation4 + $0x6] sm:$0x3]  ;;  %v329_v58 = vld [vmem:[#allocation4 + $0x2] sm:$0x3] }
 0x283   : > { %340 = vst.msk [vmem:[%s639_s3 + $0x8] sm:$0x3] %vm317_vm8, %v332_v56  ;;  %v333_v60 = vld [vmem:[#allocation4 + $0xa] sm:$0x3]  ;;  %v335_v61 = vld [vmem:[#allocation4 + $0xe] sm:$0x3] }
 0x284   : > { %339 = vst.msk [vmem:[%s639_s3 + $0x6] sm:$0x3] %vm317_vm8, %v331_v57  ;;  %v334_v62 = vld [vmem:[#allocation4 + $0xc] sm:$0x3] }
 0x285   : > { %337 = vst.msk [vmem:[%s639_s3 + $0x2] sm:$0x3] %vm317_vm8, %v329_v58 }
 0x286   : > { %341 = vst.msk [vmem:[%s639_s3 + $0xa] sm:$0x3] %vm317_vm8, %v333_v60 }
 0x287   : > { %343 = vst.msk [vmem:[%s639_s3 + $0xe] sm:$0x3] %vm317_vm8, %v335_v61 }
 0x288   : > { %366 = vrot.lane.b32.xlu1 %v347_v49, %s489_s24  ;;  %362 = vrot.lane.b32.xlu0 %v345_v50, %s489_s24  ;;  %342 = vst.msk [vmem:[%s639_s3 + $0xc] sm:$0x3] %vm317_vm8, %v334_v62 }
 0x289   : > { %370 = vrot.lane.b32.xlu2 %v349_v51, %s489_s24 }
 0x290   : > { %374 = vrot.lane.b32.xlu1 %v351_v52, %s489_s24  ;;  %372 = vrot.lane.b32.xlu0 %v350_v53, %s489_s24 }
 0x2db   : > { %v369_v59 = vpop.permute.xlu2 %368 }
 0x2dc   : > { %389 = vst.msk [vmem:[%s639_s3 + $0x8] sm:$0x3] %vm384_vm10, %v369_v59 }
 0x2e3   : > { %v371_v63 = vpop.permute.xlu2 %370 }
 0x2e4   : > { %390 = vst.msk [vmem:[%s639_s3 + $0xa] sm:$0x3] %vm384_vm10, %v371_v63 }
 0x2f2   : > { %v365_v0 = vpop.permute.xlu1 %364  ;;  %v361_v1 = vpop.permute.xlu0 %360 }
 0x2f3   : > { %387 = vst.msk [vmem:[%s639_s3 + $0x4] sm:$0x3] %vm384_vm10, %v365_v0 }
 0x2f4   : > { %385 = vst.msk [vmem:[%s639_s3] sm:$0x3] %vm384_vm10, %v361_v1 }
 0x2fa   : > { %v367_v2 = vpop.permute.xlu1 %366  ;;  %v363_v3 = vpop.permute.xlu0 %362 }
 0x2fb   : > { %388 = vst.msk [vmem:[%s639_s3 + $0x6] sm:$0x3] %vm384_vm10, %v367_v2 }
 0x2fc   : > { %386 = vst.msk [vmem:[%s639_s3 + $0x2] sm:$0x3] %vm384_vm10, %v363_v3 }
 0x302   : > { %v375_v4 = vpop.permute.xlu1 %374  ;;  %v373_v5 = vpop.permute.xlu0 %372 }
 0x303   : > { %392 = vst.msk [vmem:[%s639_s3 + $0xe] sm:$0x3] %vm384_vm10, %v375_v4 }
 0x304   : > { %391 = vst.msk [vmem:[%s639_s3 + $0xc] sm:$0x3] %vm384_vm10, %v373_v5 }
 0x305 PF: > { %s13_s12 = sadd.s32 1, %s483_s12  }
 0x306   : > { %p10_p7 = scmp.ge.s32.totalorder %s13_s12, 10  }
 0x308   :  { %12 = sbr.rel (!%p10_p7) target bundleno = 1 (0x1), region = 73 }

// kernel: sent_encoder_forward.3
= control target key start
LH: loop header
LB: loop body
LE: loop exit
PB: predicated region body
PF: predicated region fallthrough
CT: control target
= control target key end

     0   :  { %s611_s15 = smov 0   ;;  %s769_s0 = inlined_call_operand.vmem [shape: f32[8,2,256], index: 0, kind: input, shape index: {}, may-alias: {0,1}]   ;;  %s770_s1 = inlined_call_operand.vmem [shape: f32[8,2,256], index: 1, kind: input, shape index: {}, may-alias: {0,1}]   ;;  %s771_s2 = inlined_call_operand.vmem [shape: f32[32,256], index: 2, kind: input, shape index: {}]   ;;  %s772_s3 = inlined_call_operand.vmem [shape: f32[8,2,1], index: 3, kind: input, shape index: {}]   ;;  %s773_s4 = inlined_call_operand.vmem [shape: f32[8,2,64], index: 4, kind: output, shape index: {}]  }
   0x1 LB: > { %s617_s16 = sadd.s32 4294967295, %s578_s15   ;;  %p531_p0 = scmp.ge.s32.totalorder %s578_s15, 1  ;;  %s578_s15 = sphi %s611_s15, %s14_s15  }
   0x2   : > { %p171_p1 = scmp.lt.s32.totalorder %s578_s15, 9 }
   0x4   : > { %p172_p2 = pnand %p531_p0, %p171_p1 }
   0x5   : > { %p198_p3 = scmp.lt.s32.totalorder (!%p172_p2), %s617_s16, 7  ;;  %s623_s17 = ssub.s32 (!%p172_p2), 7, %s617_s16 }
   0x6   : > { %175 = sbr.rel (%p172_p2) target bundleno = 892 (0x37c), region = 36  ;;  %p204_p4 = scmp.lt.s32.totalorder (!%p172_p2), %s623_s17, 7 }
   0x7   : > { %p536_p5 = scmp.ne.s32.totalorder (!%p172_p2), %s617_s16, 0 }
   0xb   : > { %s199_s18 = scalar_select %p198_p3, %s617_s16, 7 }
   0xc   : > { %s205_s19 = scalar_select %p204_p4, %s623_s17, 7 }
   0xd   : > { %s545_s20 = sshll.u32 %s199_s18, 2  ;;  %213 = sbr.rel (%p536_p5) target bundleno = 21 (0x15), region = 40 }
   0xe   : > { %s631_s23 = scalar_lea.vmem %s769_s0, %s545_s20  ;;  %s546_s24 = sshll.u32 %s205_s19, 2 }
   0xf   : > { %s208_s27 = scalar_lea.vmem %s770_s1, %s546_s24 }
  0x12   : > { %vm214_vm0 = vcmask 257024   ;;  %v580_v0 = vmov 0.0  }
  0x13   : > { %215 = vst.msk [vmem:[#allocation2] sm:$0xf] %vm214_vm0, %v580_v0 }
  0x14   : > { %216 = vst.msk [vmem:[#allocation3] sm:$0xf] %vm214_vm0, %v580_v0 }
  0x15 PF: > { %v225_v1 = vld [vmem:[%s771_s2 + $0x38] sm:$0xff]  ;;  %v223_v2 = vld [vmem:[%s771_s2 + $0x28] sm:$0xff]  ;;  %v224_v3 = vld [vmem:[%s771_s2 + $0x30] sm:$0xff]  ;;  %vm226_vm1 = vcmask 261120   ;;  %vm287_vm2 = vcmask 1041408   ;;  %s581_s21 = smov 32  }
  0x16   : > { %262 = vmatpush.msra.mxu1 %v225_v1  ;;  %v221_v4 = vld [vmem:[%s771_s2 + $0x18] sm:$0xff]  ;;  %242 = vmatpush.msra.mxu0 %v224_v3  ;;  %v222_v5 = vld [vmem:[%s771_s2 + $0x20] sm:$0xff]  ;;  %v220_v6 = vld [vmem:[%s771_s2 + $0x10] sm:$0xff]  ;;  %s582_s22 = smov 96   ;;  %vm335_vm7 = vcmask 257024   ;;  %s540_s24 = sshll.u32 %s617_s16, 1 }
  0x17   : > { %v219_v7 = vld [vmem:[%s771_s2 + $0x8] sm:$0xff]  ;;  %v218_v9 = vld [vmem:[%s771_s2] sm:$0xff]  ;;  %s541_s25 = sshll.u32 %s623_s17, 1  ;;  %vm344_vm8 = vcmask 254976   ;;  %vm349_vm9 = vcmask 257026   ;;  %s343_s26 = scalar_lea.vmem [#allocation4], %s540_s24 }
  0x18   : > { %263 = vmatpush.msra.mxu1 %v223_v2  ;;  %243 = vmatpush.msra.mxu0 %v222_v5  ;;  %v271_v11 = vld [vmem:[%s208_s27] sm:$0xf]  ;;  %s348_s27 = scalar_lea.vmem [#allocation5], %s541_s25  ;;  %p542_p6 = scmp.ne.s32.totalorder %s617_s16, 7 }
  0x19   : > { %v274_v12 = vrot.slane %v271_v11, 2  ;;  %v270_v16 = vld [vmem:[%s631_s23] sm:$0xf]  ;;  %s583_s23 = smov 64   ;;  %s585_s25 = smov (!%p542_p6), 32  }
  0x1a   : > { %264 = vmatpush.msra.mxu1 %v221_v4  ;;  %v217_v8 = vld [vmem:[#allocation2] sm:$0xf]  ;;  %244 = vmatpush.msra.mxu0 %v220_v6 }
  0x1b   : > { %v309_v21 = vld [vmem:[#allocation3] sm:$0xf] }
  0x1c   : > { %265 = vmatpush.msra.mxu1 %v219_v7  ;;  %245 = vmatpush.msra.mxu0 %v218_v9 }
  0x1d   : > { %538 = vmatmul.msk.f32.vlgmr.msra.gmra.mxu1 %vm226_vm1, %v217_v8  ;;  %537 = vmatmul.msk.f32.vlgmr.msra.gmra.mxu0 %vm226_vm1, %v217_v8 }
  0x9a   : > { %v267_v10 = vpop.f32.mrf.mxu1  ;;  %v247_v15 = vpop.f32.mrf.mxu0 }
  0x9b   : > { %277 = vst.sshfl [vmem:[#allocation1] sm:$0xff pattern:$0x73625140] %v267_v10  ;;  %v272_v17 = vadd.f32 %v270_v16, %v247_v15 }
  0xa2   : > { %v279_v13 = vld [vmem:[#allocation1 + $0x1] ss:$4 sm:$0xff] }
  0xa3   : > { %v281_v14 = vadd.f32 %v279_v13, %v274_v12 }
  0xa5   : > { %284 = vst [vmem:[#allocation1 + $0x1] ss:$4 sm:$0xff] %v281_v14 }
  0xac   : > { %v285_v18 = vld.sshfl [vmem:[#allocation1] sm:$0xff pattern:$0x73625140] }
  0xad   : > { %v288_v19 = vsel %vm287_vm2, %v272_v17, %v285_v18 }
  0xae   : > { %561 = vtanh.f32 %v288_v19  ;;  %v539_v22 = vmul.f32 -1.442695, %v288_v19 }
  0xb0   : > { %563 = vpow2.f32 %v539_v22 }
  0xb4   : > { %v562_v20 = vpop.eup %561 }
  0xb5   : > { %316 = vrot.lane.b32.xlu0 %v562_v20, %s581_s21 }
  0xb6   : > { %v564_v23 = vpop.eup %563 }
  0xb7   : > { %v292_v24 = vadd.f32 1.0, %v564_v23 }
  0xb9   : > { %565 = vrcp.f32 %v292_v24  ;;  %v304_v30 = vand.u32 2147483648, %v292_v24  ;;  %vm298_vm4 = vweird.f32 %v292_v24  ;;  %v302_v31 = vand.u32 2147483647, %v292_v24 }
  0xbb   : > { %v305_v33 = vor.u32 1.1754944e-38, %v304_v30  ;;  %vm303_vm6 = vcmp.eq.f32.partialorder %v302_v31, 8.507059e+37 }
  0xbd   : > { %311 = vrot.lane.b32.xlu0 %v309_v21, %s581_s21 }
  0xbf   : > { %v566_v25 = vpop.eup %565 }
  0xc0   : > { %v294_v26 = vmul.f32 %v566_v25, %v292_v24  ;;  %vm299_vm3 = vweird.f32 %v566_v25 }
  0xc1   : > { %vm300_vm5 = vmor %vm298_vm4, %vm299_vm3 }
  0xc2   : > { %v295_v27 = vsub.f32 1.0, %v294_v26 }
  0xc4   : > { %v296_v28 = vmul.f32 %v566_v25, %v295_v27 }
  0xc6   : > { %v297_v29 = vadd.f32 %v566_v25, %v296_v28 }
  0xc8   : > { %v301_v32 = vsel %vm300_vm5, %v566_v25, %v297_v29 }
  0xc9   : > { %v306_v35 = vsel %vm303_vm6, %v305_v33, %v301_v32 }
 0x127   : > { %v317_v34 = vpop.permute.xlu0 %316 }
 0x128   : > { %v319_v36 = vmul.f32 %v317_v34, %v306_v35 }
 0x12a   : > { %321 = vrot.lane.b32.xlu1 %v319_v36, %s581_s21 }
 0x12f   : > { %v312_v37 = vpop.permute.xlu0 %311 }
 0x130   : > { %v314_v38 = vmul.f32 %v312_v37, %v306_v35 }
 0x19c   : > { %v322_v39 = vpop.permute.xlu1 %321 }
 0x19d   : > { %v324_v40 = vadd.f32 %v322_v39, %v314_v38 }
 0x19f   : > { %567 = vtanh.f32 %v324_v40  ;;  %332 = vrot.lane.b32.xlu2 %v324_v40, %s582_s22 }
 0x1a5   : > { %v568_v41 = vpop.eup %567 }
 0x1a6   : > { %327 = vrot.lane.b32.xlu1 %v568_v41, %s581_s21 }
 0x1f9   : > { %v333_v42 = vpop.permute.xlu2 %332 }
 0x1fa   : > { %336 = vst.msk [vmem:[#allocation3] sm:$0xf] %vm335_vm7, %v333_v42 }
 0x218   : > { %v328_v43 = vpop.permute.xlu1 %327 }
 0x219   : > { %v330_v44 = vmul.f32 %v328_v43, %v306_v35 }
 0x21b   : > { %338 = vrot.lane.b32.xlu2 %v330_v44, %s583_s23 }
 0x274   : > { %354 = sbr.rel (%p542_p6) target bundleno = 892 (0x37c), region = 44 }
 0x275   : > { %v339_v45 = vpop.permute.xlu2 %338 }
 0x276   : > { %341 = vst.msk [vmem:[#allocation2] sm:$0xf] %vm335_vm7, %v339_v45 }
 0x277   : > { %345 = vst.msk [vmem:[%s343_s26] sm:$0x3] %vm344_vm8, %v339_v45 }
 0x278   : > { %350 = vst.msk [vmem:[%s348_s27 - $0x2] sm:$0xc] %vm349_vm9, %v339_v45 }
 0x279   : > { %v357_v46 = vld [vmem:[%s772_s3 + $0x4] sm:$0x3]  ;;  %v355_v47 = vld [vmem:[%s772_s3] sm:$0x3]  ;;  %v584_v48 = vmov 0   ;;  %vm475_vm10 = vcmask 517376  }
 0x27a   : > { %570 = vset.pattern.permute.xlu1 %v584_v48  ;;  %569 = vset.pattern.permute.xlu0 %v584_v48  ;;  %v359_v49 = vld [vmem:[%s772_s3 + $0x8] sm:$0x3]  ;;  %v358_v50 = vld [vmem:[%s772_s3 + $0x6] sm:$0x3]  ;;  %v356_v51 = vld [vmem:[%s772_s3 + $0x2] sm:$0x3] }
 0x27b   : > { %383 = vperm.xlu1 %570, %v357_v46   ;;  %373 = vperm.xlu0 %569, %v355_v47   ;;  %v360_v52 = vld [vmem:[%s772_s3 + $0xa] sm:$0x3]  ;;  %v362_v53 = vld [vmem:[%s772_s3 + $0xe] sm:$0x3]  ;;  %v361_v54 = vld [vmem:[%s772_s3 + $0xc] sm:$0x3] }
 0x27c   : > { %571 = vset.pattern.permute.xlu2 %v584_v48 }
 0x27d   : > { %393 = vperm.xlu2 %571, %v359_v49  }
 0x27e   : > { %v367_v55 = vld [vmem:[#allocation4 + $0x8] sm:$0x3]  ;;  %v368_v58 = vld [vmem:[#allocation4 + $0xa] sm:$0x3]  ;;  %v365_v61 = vld [vmem:[#allocation4 + $0x4] sm:$0x3] }
 0x27f   : > { %v429_v62 = vld [vmem:[#allocation5 + $0x4] sm:$0x3]  ;;  %v363_v63 = vld [vmem:[#allocation4] sm:$0x3]  ;;  %v427_v0 = vld [vmem:[#allocation5] sm:$0x3] }
 0x280   : > { %v366_v7 = vld [vmem:[#allocation4 + $0x6] sm:$0x3]  ;;  %v432_v8 = vld [vmem:[#allocation5 + $0xa] sm:$0x3]  ;;  %v430_v9 = vld [vmem:[#allocation5 + $0x6] sm:$0x3] }
 0x281   : > { %v364_v10 = vld [vmem:[#allocation4 + $0x2] sm:$0x3]  ;;  %v428_v11 = vld [vmem:[#allocation5 + $0x2] sm:$0x3]  ;;  %v431_v19 = vld [vmem:[#allocation5 + $0x8] sm:$0x3] }
 0x282   : > { %v370_v20 = vld [vmem:[#allocation4 + $0xe] sm:$0x3]  ;;  %v369_v21 = vld [vmem:[#allocation4 + $0xc] sm:$0x3]  ;;  %v433_v22 = vld [vmem:[#allocation5 + $0xc] sm:$0x3] }
 0x283   : > { %388 = vperm.xlu1 %570, %v358_v50   ;;  %378 = vperm.xlu0 %569, %v356_v51   ;;  %v434_v29 = vld [vmem:[#allocation5 + $0xe] sm:$0x3] }
 0x285   : > { %398 = vperm.xlu2 %571, %v360_v52  }
 0x28b   : > { %408 = vperm.xlu1 %570, %v362_v53   ;;  %403 = vperm.xlu0 %569, %v361_v54  }
 0x2d7   : > { %v394_v56 = vpop.permute.xlu2 %393 }
 0x2d8   : > { %v415_v57 = vmul.f32 %v394_v56, %v367_v55  ;;  %v439_v23 = vmul.f32 %v431_v19, %v394_v56 }
 0x2da   : > { %423 = vst.msk [vmem:[%s773_s4 + $0x8] sm:$0x3] %vm344_vm8, %v415_v57 }
 0x2df   : > { %v399_v59 = vpop.permute.xlu2 %398 }
 0x2e0   : > { %v416_v60 = vmul.f32 %v399_v59, %v368_v58  ;;  %v440_v14 = vmul.f32 %v432_v8, %v399_v59 }
 0x2e2   : > { %424 = vst.msk [vmem:[%s773_s4 + $0xa] sm:$0x3] %vm344_vm8, %v416_v60 }
 0x2ed   : > { %v384_v1 = vpop.permute.xlu1 %383  ;;  %v374_v2 = vpop.permute.xlu0 %373 }
 0x2ee   : > { %v413_v3 = vmul.f32 %v384_v1, %v365_v61  ;;  %v437_v4 = vmul.f32 %v429_v62, %v384_v1  ;;  %v411_v5 = vmul.f32 %v374_v2, %v363_v63  ;;  %v435_v6 = vmul.f32 %v427_v0, %v374_v2 }
 0x2f0   : > { %421 = vst.msk [vmem:[%s773_s4 + $0x4] sm:$0x3] %vm344_vm8, %v413_v3  ;;  %451 = vrot.lane.b32.xlu2 %v435_v6, %s585_s25  ;;  %455 = vrot.lane.b32.xlu1 %v437_v4, %s585_s25 }
 0x2f1   : > { %419 = vst.msk [vmem:[%s773_s4] sm:$0x3] %vm344_vm8, %v411_v5 }
 0x2f5   : > { %v389_v12 = vpop.permute.xlu1 %388  ;;  %v379_v13 = vpop.permute.xlu0 %378 }
 0x2f6   : > { %v414_v15 = vmul.f32 %v389_v12, %v366_v7  ;;  %v438_v16 = vmul.f32 %v430_v9, %v389_v12  ;;  %v412_v17 = vmul.f32 %v379_v13, %v364_v10  ;;  %v436_v18 = vmul.f32 %v428_v11, %v379_v13 }
 0x2f8   : > { %422 = vst.msk [vmem:[%s773_s4 + $0x6] sm:$0x3] %vm344_vm8, %v414_v15  ;;  %457 = vrot.lane.b32.xlu2 %v438_v16, %s585_s25  ;;  %453 = vrot.lane.b32.xlu0 %v436_v18, %s585_s25 }
 0x2f9   : > { %420 = vst.msk [vmem:[%s773_s4 + $0x2] sm:$0x3] %vm344_vm8, %v412_v17  ;;  %461 = vrot.lane.b32.xlu1 %v440_v14, %s585_s25 }
 0x2fd   : > { %v409_v24 = vpop.permute.xlu1 %408  ;;  %v404_v25 = vpop.permute.xlu0 %403 }
 0x2fe   : > { %v418_v26 = vmul.f32 %v409_v24, %v370_v20  ;;  %v417_v27 = vmul.f32 %v404_v25, %v369_v21  ;;  %v441_v28 = vmul.f32 %v433_v22, %v404_v25  ;;  %v442_v30 = vmul.f32 %v434_v29, %v409_v24 }
 0x300   : > { %426 = vst.msk [vmem:[%s773_s4 + $0xe] sm:$0x3] %vm344_vm8, %v418_v26  ;;  %459 = vrot.lane.b32.xlu0 %v439_v23, %s585_s25  ;;  %463 = vrot.lane.b32.xlu2 %v441_v28, %s585_s25 }
 0x301   : > { %425 = vst.msk [vmem:[%s773_s4 + $0xc] sm:$0x3] %vm344_vm8, %v417_v27 }
 0x308   : > { %465 = vrot.lane.b32.xlu0 %v442_v30, %s585_s25 }
 0x34a   : > { %v452_v31 = vpop.permute.xlu2 %451 }
 0x34b   : > { %476 = vst.msk [vmem:[%s773_s4] sm:$0x3] %vm475_vm10, %v452_v31 }
 0x352   : > { %v458_v32 = vpop.permute.xlu2 %457 }
 0x353   : > { %479 = vst.msk [vmem:[%s773_s4 + $0x6] sm:$0x3] %vm475_vm10, %v458_v32 }
 0x35a   : > { %v464_v33 = vpop.permute.xlu2 %463 }
 0x35b   : > { %482 = vst.msk [vmem:[%s773_s4 + $0xc] sm:$0x3] %vm475_vm10, %v464_v33 }
 0x362   : > { %v456_v34 = vpop.permute.xlu1 %455 }
 0x363   : > { %478 = vst.msk [vmem:[%s773_s4 + $0x4] sm:$0x3] %vm475_vm10, %v456_v34 }
 0x36a   : > { %v454_v35 = vpop.permute.xlu0 %453 }
 0x36b   : > { %477 = vst.msk [vmem:[%s773_s4 + $0x2] sm:$0x3] %vm475_vm10, %v454_v35  ;;  %v462_v36 = vpop.permute.xlu1 %461 }
 0x36c   : > { %481 = vst.msk [vmem:[%s773_s4 + $0xa] sm:$0x3] %vm475_vm10, %v462_v36 }
 0x372   : > { %v460_v37 = vpop.permute.xlu0 %459 }
 0x373   : > { %480 = vst.msk [vmem:[%s773_s4 + $0x8] sm:$0x3] %vm475_vm10, %v460_v37 }
 0x37a   : > { %v466_v38 = vpop.permute.xlu0 %465 }
 0x37b   : > { %483 = vst.msk [vmem:[%s773_s4 + $0xe] sm:$0x3] %vm475_vm10, %v466_v38 }
 0x37c PF: > { %s14_s15 = sadd.s32 1, %s578_s15  }
 0x37d   : > { %p11_p7 = scmp.ge.s32.totalorder %s14_s15, 10  }
 0x37f   :  { %13 = sbr.rel (!%p11_p7) target bundleno = 1 (0x1), region = 77 }

</bundles_post_ra>
